<compile_context>
chip_gen: v7x
topology: tpu7x:2x2x1
jax: 0.10.0
libtpu: 0.0.40
codegen_flags: <defaults>
</compile_context>

<pallas_src>
import functools

import jax
import jax.numpy as jnp
from jax.experimental import pallas as pl
from jax.experimental.pallas import tpu as pltpu


def _round_up(x, m):
    return ((x + m - 1) // m) * m


def _cdiv(a, b):
    return -(-a // b)


# ---------------------------------------------------------------------------
# Kernel
# ---------------------------------------------------------------------------
def _parser_mlp_kernel(*refs, dropout_p, use_dropout):
    if use_dropout:
        seed_ref, x_ref, w1_ref, b1_ref, w2_ref, b2_ref, o_ref = refs
    else:
        x_ref, w1_ref, b1_ref, w2_ref, b2_ref, o_ref = refs

    # (TILE_B, inpsize) @ (inpsize, HP) -> f32 accumulate on the MXU.
    h = jnp.dot(x_ref[...], w1_ref[...],
                preferred_element_type=jnp.float32) + b1_ref[...]
    cube = h * h * h                      # torch.pow(hidden_out, 3), kept in f32

    if use_dropout:
        # Inverted dropout.  Stateless hash PRNG (murmur-style fmix32) over the
        # GLOBAL (row, col) index + seed: pure jnp integer ops (no pltpu.prng_*),
        # so it lowers both on TPU and in interpret mode, and the mask is
        # independent of the batch-tile size.  Vary `seed` per training step.
        tb, hp = cube.shape
        keep_prob = 1.0 - dropout_p
        row = jax.lax.broadcasted_iota(jnp.int32, (tb, hp), 0).astype(jnp.uint32)
        col = jax.lax.broadcasted_iota(jnp.int32, (tb, hp), 1).astype(jnp.uint32)
        grow = row + jnp.uint32(tb) * pl.program_id(0).astype(jnp.uint32)
        bits = grow * jnp.uint32(hp) + col
        bits = bits ^ (seed_ref[0].astype(jnp.uint32) * jnp.uint32(0x9E3779B9))
        bits = bits ^ (bits >> 16)
        bits = bits * jnp.uint32(0x7FEB352D)
        bits = bits ^ (bits >> 15)
        bits = bits * jnp.uint32(0x846CA68B)
        bits = bits ^ (bits >> 16)
        thresh = jnp.uint32(int(keep_prob * (2.0 ** 32)))
        cube = jnp.where(bits < thresh, cube * (1.0 / keep_prob), 0.0)

    logits = jnp.dot(cube.astype(w2_ref.dtype), w2_ref[...],
                     preferred_element_type=jnp.float32) + b2_ref[...]
    o_ref[...] = logits.astype(o_ref.dtype)


# ---------------------------------------------------------------------------
# One-time weight preparation (pad to lane-dense shapes, cast).
# Call this ONCE (at init / after a weight update), not per forward call.
# ---------------------------------------------------------------------------
def prepare_params(params, param_dtype=jnp.bfloat16):
    w1, b1, w2, b2 = params["w1"], params["b1"], params["w2"], params["b2"]
    inpsize, H = w1.shape
    n_out = w2.shape[1]
    HP = _round_up(max(H, 128), 128)
    NP = _round_up(max(n_out, 128), 128)
    return {
        # Pre-cast embedding tables so the gather/concat already emits `joined`
        # in the kernel's matmul dtype (no extra wrapper-side cast of the
        # whole activation).
        "wordembed": params["wordembed"].astype(param_dtype),
        "posembed": params["posembed"].astype(param_dtype),
        "labelembed": params["labelembed"].astype(param_dtype),
        # Zero-padded columns/rows contribute exactly zero -> numerics unchanged.
        "w1p": jnp.pad(w1, ((0, 0), (0, HP - H))).astype(param_dtype),
        "b1p": jnp.pad(jnp.reshape(b1, (1, -1)),
                       ((0, 0), (0, HP - H))).astype(jnp.float32),
        "w2p": jnp.pad(w2, ((0, HP - H), (0, NP - n_out))).astype(param_dtype),
        "b2p": jnp.pad(jnp.reshape(b2, (1, -1)),
                       ((0, 0), (0, NP - n_out))).astype(jnp.float32),
    }


# ---------------------------------------------------------------------------
# Wrapper: tile the batch axis and call the kernel.
# ---------------------------------------------------------------------------
def parser_mlp(joined, w1p, b1p, w2p, b2p, *, n_out=3, dropout_p=0.3,
               training=False, seed=0, max_tile_b=None):
    """hidden -> cube -> dropout -> logits for a batch of parser states.

    joined: (B, inpsize); w1p: (inpsize, HP); b1p: (1, HP) f32
    w2p: (HP, NP); b2p: (1, NP) f32.  Returns (B, n_out) f32.
    """
    B, inpsize = joined.shape
    HP = w1p.shape[1]
    NP = w2p.shape[1]
    param_dtype = w1p.dtype

    x = joined.astype(param_dtype)       # no-op when the gather already matches

    # Batch tiling: big tiles to amortize per-step overhead (kernel is
    # HBM-bound), rounded for sublane packing (8 f32 / 16 bf16), but split into
    # >= 2 grid steps when the batch allows so v7x's two TensorCores both work.
    is_bf16 = param_dtype == jnp.bfloat16
    mult = 16 if is_bf16 else 8
    if max_tile_b is None:
        max_tile_b = 4096 if is_bf16 else 2048   # well under v5e's 16 MiB scoped VMEM
    if B <= mult:
        tile_b = mult
    else:
        tile_b = min(max_tile_b, _round_up(_cdiv(B, 2), mult))
    nb = _cdiv(B, tile_b)                # ragged last tile handled by masking

    use_dropout = bool(training) and float(dropout_p) > 0.0
    kernel = functools.partial(_parser_mlp_kernel,
                               dropout_p=float(dropout_p),
                               use_dropout=use_dropout)

    # index_maps take (*grid, *prefetch_refs); *_ absorbs the optional seed ref.
    # Weights use constant index_maps so they stay VMEM-resident across steps.
    x_spec = pl.BlockSpec((tile_b, inpsize), lambda i, *_: (i, 0))
    w1_spec = pl.BlockSpec((inpsize, HP), lambda i, *_: (0, 0))
    b1_spec = pl.BlockSpec((1, HP), lambda i, *_: (0, 0))
    w2_spec = pl.BlockSpec((HP, NP), lambda i, *_: (0, 0))
    b2_spec = pl.BlockSpec((1, NP), lambda i, *_: (0, 0))
    out_spec = pl.BlockSpec((tile_b, NP), lambda i, *_: (i, 0))

    grid_spec = pltpu.PrefetchScalarGridSpec(
        num_scalar_prefetch=1 if use_dropout else 0,
        grid=(nb,),
        in_specs=[x_spec, w1_spec, b1_spec, w2_spec, b2_spec],
        out_specs=out_spec,
    )

    args = (x, w1p, b1p, w2p, b2p)
    if use_dropout:
        args = (jnp.asarray([seed], dtype=jnp.int32),) + args

    out = pl.pallas_call(
        kernel,
        grid_spec=grid_spec,
        # Lane-dense (128-col) store; bf16 when params are bf16 to halve writeback.
        out_shape=jax.ShapeDtypeStruct((B, NP), param_dtype),
        compiler_params=pltpu.CompilerParams(
            dimension_semantics=("parallel",)),
    )(*args)

    # Slice the lane-dense result back to the logical (B, n_out), upcast to f32.
    return out[:, :n_out].astype(jnp.float32)


# ---------------------------------------------------------------------------
# Full forward: embedding gather + concat (plain-JAX glue) + Pallas MLP.
# In a hot parse/train loop, jit this function and reuse `prep`.
# ---------------------------------------------------------------------------
def _gather_join(prep, wordid, posid, labelid):
    wordid = jnp.atleast_2d(jnp.asarray(wordid))     # (B, 6)
    posid = jnp.atleast_2d(jnp.asarray(posid))
    labelid = jnp.atleast_2d(jnp.asarray(labelid))
    B = wordid.shape[0]
    wordemb = prep["wordembed"][wordid].reshape(B, -1)
    posemb = prep["posembed"][posid].reshape(B, -1)
    labelemb = prep["labelembed"][labelid].reshape(B, -1)
    return jnp.concatenate([wordemb, posemb, labelemb], axis=1)


def parser_forward(prep, wordid, posid, labelid, *, n_out=3, dropout_p=0.3,
                   training=False, seed=0):
    joined = _gather_join(prep, wordid, posid, labelid)
    return parser_mlp(joined, prep["w1p"], prep["b1p"], prep["w2p"], prep["b2p"],
                      n_out=n_out, dropout_p=dropout_p, training=training,
                      seed=seed)


def parser_predict(prep, wordid, posid, labelid):
    """Eval-mode argmax over the 3 transition logits (mirrors Module.predict)."""
    logits = parser_forward(prep, wordid, posid, labelid, training=False)
    return jnp.argmax(logits, axis=1)


# ---------------------------------------------------------------------------
# Init + pure-JAX reference (eval mode: dropout = identity).
# ---------------------------------------------------------------------------
def _init_params(key, wordvocab, posvocab, labelvocab, worddim, posdim,
                 labeldim, hidden):
    inpsize = 6 * worddim + 6 * posdim + 6 * labeldim
    ks = jax.random.split(key, 7)
    return {
        "wordembed": jax.random.normal(ks[0], (wordvocab, worddim), jnp.float32) * 0.1,
        "posembed": jax.random.normal(ks[1], (posvocab, posdim), jnp.float32) * 0.1,
        "labelembed": jax.random.normal(ks[2], (labelvocab, labeldim), jnp.float32) * 0.1,
        # stored (in_features, out_features) so the kernel does x @ W + b
        "w1": jax.random.normal(ks[3], (inpsize, hidden), jnp.float32) * 0.05,
        "b1": jax.random.normal(ks[4], (1, hidden), jnp.float32) * 0.01,
        "w2": jax.random.normal(ks[5], (hidden, 3), jnp.float32) * 0.05,
        "b2": jax.random.normal(ks[6], (1, 3), jnp.float32) * 0.01,
    }


def _reference_forward(params, wordid, posid, labelid):
    wordid = jnp.atleast_2d(jnp.asarray(wordid))
    posid = jnp.atleast_2d(jnp.asarray(posid))
    labelid = jnp.atleast_2d(jnp.asarray(labelid))
    B = wordid.shape[0]
    joined = jnp.concatenate(
        [params["wordembed"][wordid].reshape(B, -1),
         params["posembed"][posid].reshape(B, -1),
         params["labelembed"][labelid].reshape(B, -1)], axis=1)
    h = jnp.dot(joined, params["w1"],
                precision=jax.lax.Precision.HIGHEST) + params["b1"]
    cube = h ** 3
    return jnp.dot(cube, params["w2"],
                   precision=jax.lax.Precision.HIGHEST) + params["b2"]


if __name__ == "__main__":
    # Small, module-consistent shapes.
    wordvocab, posvocab, labelvocab = 50, 20, 10
    worddim, posdim, labeldim = 16, 8, 8
    hidden = 32
    B = 4  # small batch of parser configurations

    key = jax.random.PRNGKey(0)
    kparam, kw, kp, kl = jax.random.split(key, 4)
    params = _init_params(kparam, wordvocab, posvocab, labelvocab,
                          worddim, posdim, labeldim, hidden)

    # Each parser configuration provides 6 word ids, 6 POS ids, 6 label ids.
    wordid = jax.random.randint(kw, (B, 6), 0, wordvocab, dtype=jnp.int32)
    posid = jax.random.randint(kp, (B, 6), 0, posvocab, dtype=jnp.int32)
    labelid = jax.random.randint(kl, (B, 6), 0, labelvocab, dtype=jnp.int32)

    # --- f32 accuracy path: single-state (matches original forward: (1, 3)) --
    prep_f32 = prepare_params(params, param_dtype=jnp.float32)
    logits1 = parser_forward(prep_f32, wordid[0], posid[0], labelid[0],
                             training=False)
    logits1 = jax.block_until_ready(logits1)
    ref1 = _reference_forward(params, wordid[0], posid[0], labelid[0])
    assert logits1.shape == (1, 3)
    assert jnp.allclose(logits1, ref1, atol=5e-4, rtol=1e-3), (logits1, ref1)

    # --- f32 batched eval path --------------------------------------------
    logits_b = jax.block_until_ready(
        parser_forward(prep_f32, wordid, posid, labelid, training=False))
    ref_b = _reference_forward(params, wordid, posid, labelid)
    assert logits_b.shape == (B, 3)
    assert jnp.allclose(logits_b, ref_b, atol=5e-4, rtol=1e-3), (logits_b, ref_b)

    # --- bf16 default perf path: bigger, ragged batch (2 grid steps) --------
    Bbig = 300
    kw2, kp2, kl2 = jax.random.split(jax.random.PRNGKey(1), 3)
    wordid_big = jax.random.randint(kw2, (Bbig, 6), 0, wordvocab, dtype=jnp.int32)
    posid_big = jax.random.randint(kp2, (Bbig, 6), 0, posvocab, dtype=jnp.int32)
    labelid_big = jax.random.randint(kl2, (Bbig, 6), 0, labelvocab, dtype=jnp.int32)
    prep_bf16 = prepare_params(params, param_dtype=jnp.bfloat16)
    logits_big = jax.block_until_ready(
        parser_forward(prep_bf16, wordid_big, posid_big, labelid_big,
                       training=False))
    ref_big = _reference_forward(params, wordid_big, posid_big, labelid_big)
    assert logits_big.shape == (Bbig, 3)
    assert jnp.allclose(logits_big, ref_big, atol=2e-3, rtol=2e-1)

    # --- predict path (argmax over 3 transitions) ---------------------------
    preds = jax.block_until_ready(
        parser_predict(prep_bf16, wordid_big, posid_big, labelid_big))
    assert preds.shape == (Bbig,)
    assert bool(jnp.all((preds >= 0) & (preds < 3)))

    # --- training path (dropout active; stochastic, so only sanity checks) --
    logits_t = jax.block_until_ready(
        parser_forward(prep_f32, wordid, posid, labelid,
                       dropout_p=0.3, training=True, seed=123))
    assert logits_t.shape == (B, 3)
    assert bool(jnp.all(jnp.isfinite(logits_t)))

    print("KERNEL_OK")
</pallas_src>

<mosaic_0001>
module attributes {stable_mosaic.version = 11 : i64} {
  func.func @_parser_mlp_kernel(%arg0: i32, %arg1: memref<8x192xf32, #tpu.memory_space<vmem>>, %arg2: memref<192x128xf32, #tpu.memory_space<vmem>>, %arg3: memref<1x128xf32, #tpu.memory_space<vmem>>, %arg4: memref<128x128xf32, #tpu.memory_space<vmem>>, %arg5: memref<1x128xf32, #tpu.memory_space<vmem>>, %arg6: memref<8x128xf32, #tpu.memory_space<vmem>>) attributes {dimension_semantics = [#tpu.dimension_semantics<parallel>], iteration_bounds = array<i64: 1>, scalar_prefetch = 0 : i64, scratch_operands = 0 : i64, tpu.core_type = #tpu.core_type<tc>, window_params = [{transform_indices = @transform_0, window_bounds = array<i64: 8, 192>}, {pipeline_mode = #tpu.pipeline_mode<synchronous>, transform_indices = @transform_1, window_bounds = array<i64: 192, 128>}, {pipeline_mode = #tpu.pipeline_mode<synchronous>, transform_indices = @transform_2, window_bounds = array<i64: 1, 128>}, {pipeline_mode = #tpu.pipeline_mode<synchronous>, transform_indices = @transform_3, window_bounds = array<i64: 128, 128>}, {pipeline_mode = #tpu.pipeline_mode<synchronous>, transform_indices = @transform_4, window_bounds = array<i64: 1, 128>}, {transform_indices = @transform_5, window_bounds = array<i64: 8, 128>}]} {
    %c0 = arith.constant 0 : index
    %c0_0 = arith.constant 0 : index
    %0 = vector.load %arg1[%c0, %c0_0] : memref<8x192xf32, #tpu.memory_space<vmem>>, vector<8x192xf32>
    %c0_1 = arith.constant 0 : index
    %c0_2 = arith.constant 0 : index
    %1 = vector.load %arg2[%c0_1, %c0_2] : memref<192x128xf32, #tpu.memory_space<vmem>>, vector<192x128xf32>
    %cst = arith.constant dense<0.000000e+00> : vector<8x128xf32>
    %2 = tpu.matmul %0, %1, %cst {dimension_numbers = #tpu.dot_dimension_numbers<[1], [0], [0], [1], [0, 0, 1, 1], [], []>} : vector<8x192xf32>, vector<192x128xf32>, vector<8x128xf32> -> vector<8x128xf32>
    %c0_3 = arith.constant 0 : index
    %c0_4 = arith.constant 0 : index
    %3 = vector.load %arg3[%c0_3, %c0_4] : memref<1x128xf32, #tpu.memory_space<vmem>>, vector<1x128xf32>
    %4 = vector.broadcast %3 : vector<1x128xf32> to vector<8x128xf32>
    %5 = arith.addf %2, %4 : vector<8x128xf32>
    %6 = arith.mulf %5, %5 : vector<8x128xf32>
    %7 = arith.mulf %6, %5 : vector<8x128xf32>
    %c0_5 = arith.constant 0 : index
    %c0_6 = arith.constant 0 : index
    %8 = vector.load %arg4[%c0_5, %c0_6] : memref<128x128xf32, #tpu.memory_space<vmem>>, vector<128x128xf32>
    %cst_7 = arith.constant dense<0.000000e+00> : vector<8x128xf32>
    %9 = tpu.matmul %7, %8, %cst_7 {dimension_numbers = #tpu.dot_dimension_numbers<[1], [0], [0], [1], [0, 0, 1, 1], [], []>} : vector<8x128xf32>, vector<128x128xf32>, vector<8x128xf32> -> vector<8x128xf32>
    %c0_8 = arith.constant 0 : index
    %c0_9 = arith.constant 0 : index
    %10 = vector.load %arg5[%c0_8, %c0_9] : memref<1x128xf32, #tpu.memory_space<vmem>>, vector<1x128xf32>
    %11 = vector.broadcast %10 : vector<1x128xf32> to vector<8x128xf32>
    %12 = arith.addf %9, %11 : vector<8x128xf32>
    %c0_10 = arith.constant 0 : index
    %c0_11 = arith.constant 0 : index
    %13 = vector.load %arg6[%c0_10, %c0_11] : memref<8x128xf32, #tpu.memory_space<vmem>>, vector<8x128xf32>
    tpu.vector_store %arg6[%c0_10, %c0_11], %12 {strides = array<i32>} : memref<8x128xf32, #tpu.memory_space<vmem>>, vector<8x128xf32>,
    return
  }
  func.func @transform_0(%arg0: i32) -> (i32, i32) {
    %c0_i32 = arith.constant 0 : i32
    %c0_i32_0 = arith.constant 0 : i32
    return %arg0, %c0_i32 : i32, i32
  }
  func.func @transform_1(%arg0: i32) -> (i32, i32) {
    %c0_i32 = arith.constant 0 : i32
    %c0_i32_0 = arith.constant 0 : i32
    %c0_i32_1 = arith.constant 0 : i32
    return %c0_i32, %c0_i32_0 : i32, i32
  }
  func.func @transform_2(%arg0: i32) -> (i32, i32) {
    %c0_i32 = arith.constant 0 : i32
    %c0_i32_0 = arith.constant 0 : i32
    %c0_i32_1 = arith.constant 0 : i32
    return %c0_i32, %c0_i32_0 : i32, i32
  }
  func.func @transform_3(%arg0: i32) -> (i32, i32) {
    %c0_i32 = arith.constant 0 : i32
    %c0_i32_0 = arith.constant 0 : i32
    %c0_i32_1 = arith.constant 0 : i32
    return %c0_i32, %c0_i32_0 : i32, i32
  }
  func.func @transform_4(%arg0: i32) -> (i32, i32) {
    %c0_i32 = arith.constant 0 : i32
    %c0_i32_0 = arith.constant 0 : i32
    %c0_i32_1 = arith.constant 0 : i32
    return %c0_i32, %c0_i32_0 : i32, i32
  }
  func.func @transform_5(%arg0: i32) -> (i32, i32) {
    %c0_i32 = arith.constant 0 : i32
    %c0_i32_0 = arith.constant 0 : i32
    return %arg0, %c0_i32 : i32, i32
  }
}

</mosaic_0001>

<bundles_post_ra>
// kernel: tpu_custom_call.1
= control target key start
LH: loop header
LB: loop body
LE: loop exit
PB: predicated region body
PF: predicated region fallthrough
CT: control target
= control target key end

     0   :  { %10 = vsyncpa [#allocation3], 0  ;;  %s736_s0 = inlined_call_operand.hbm [shape: f32[1,192], index: 0, kind: input, shape index: {}]   ;;  %s737_s1 = inlined_call_operand.hbm [shape: f32[192,128], index: 1, kind: input, shape index: {}]   ;;  %s738_s2 = inlined_call_operand.vmem [shape: f32[1,128], index: 2, kind: input, shape index: {}]   ;;  %s739_s3 = inlined_call_operand.hbm [shape: f32[128,128], index: 3, kind: input, shape index: {}]   ;;  %s740_s4 = inlined_call_operand.vmem [shape: f32[1,128], index: 4, kind: input, shape index: {}]   ;;  %s741_s5 = inlined_call_operand.hbm [shape: f32[1,128], index: 5, kind: output, shape index: {}]  }
   0x1   :  { %11 = vsyncpa [#allocation6], 0 }
   0x2   :  { %12 = vsyncpa [#allocation4], 0 }
   0x3   :  { %17 = vsyncadd [#allocation3], 224  ;;  %s586_s18 = smov [#allocation5]   ;;  %s492_s22 = scalar_lea.hbm %s737_s1, 3072 }
   0x4   :  { %s30_s19 = sshll.u32 %s586_s18, 4  ;;  %p493_p0 = scmp.ne.s32.totalorder %s737_s1, %s492_s22  ;;  %s31_s19 = int_to_ptr.vmem [resolvable:$true] %s30_s19 }
   0x5   :  { %p496_p1 = scmp.lt.u32.totalorder %s492_s22, %s737_s1 }
   0x7   :  { %p498_p2 = pnand %p496_p1, %p493_p0 }
   0x9   :  { %501 = shalt.err (!%p498_p2)
}
   0xa   :  { %s502_s27 = scalar_lea.vmem %s31_s19, 3072  ;;  %p507_p4 = scmp.lt.s32.totalorder %s31_s19, %s31_s19 }
   0xb   :  { %p503_p3 = scmp.ne.s32.totalorder %s31_s19, %s502_s27  ;;  %p508_p5 = scmp.lt.s32.totalorder %s502_s27, %s502_s27 }
   0xd   :  { %p509_p6 = por %p508_p5, %p507_p4 }
   0xf   :  { %p510_p7 = pnand %p509_p6, %p503_p3 }
  0x11   :  { %513 = shalt.err (!%p510_p7)
}
  0x12   :  { %s587_s28 = smov 128   ;;  %s588_s29 = smov 8  }
  0x13   :  { %36 = dma.hbm_to_vmem [thread:$0]  %s737_s1, 3072, %s31_s19, [#allocation6], %s587_s28, %s587_s28, %s588_s29  }
  0x14   :  { %s589_s7 = smov [#allocation2]   ;;  %s514_s11 = scalar_lea.hbm %s736_s0, 32 }
  0x15   :  { %s18_s8 = sshll.u32 %s589_s7, 4  ;;  %p515_p8 = scmp.ne.s32.totalorder %s736_s0, %s514_s11  ;;  %s19_s8 = int_to_ptr.vmem [resolvable:$true] %s18_s8 }
  0x16   :  { %p518_p9 = scmp.lt.u32.totalorder %s514_s11, %s736_s0 }
  0x18   :  { %p520_p10 = pnand %p518_p9, %p515_p8 }
  0x1a   :  { %523 = shalt.err (!%p520_p10)
}
  0x1b   :  { %s524_s16 = scalar_lea.vmem %s19_s8, 32  ;;  %s528_s1 = scalar_lea.vmem %s19_s8, 256 }
  0x1c   :  { %p525_p11 = scmp.ne.s32.totalorder %s19_s8, %s524_s16  ;;  %p529_p12 = scmp.lt.s32.totalorder %s19_s8, %s19_s8 }
  0x1d   :  { %p530_p13 = scmp.lt.s32.totalorder %s528_s1, %s524_s16 }
  0x1f   :  { %p531_p0 = por %p530_p13, %p529_p12 }
  0x21   :  { %p532_p1 = pnand %p531_p0, %p525_p11 }
  0x23   :  { %535 = shalt.err (!%p532_p1)
}
  0x24   :  { %s590_s17 = smov 32   ;;  %s591_s18 = smov 2  }
  0x25   :  { %24 = dma.hbm_to_vmem [thread:$0]  %s736_s0, 32, %s19_s8, [#allocation3], %s590_s17, %s590_s17, %s591_s18  }
  0x26   :  { %s592_s21 = smov [#allocation7]   ;;  %s536_s25 = scalar_lea.hbm %s739_s3, 2048 }
  0x27   :  { %s44_s22 = sshll.u32 %s592_s21, 4  ;;  %p537_p2 = scmp.ne.s32.totalorder %s739_s3, %s536_s25  ;;  %s45_s22 = int_to_ptr.vmem [resolvable:$true] %s44_s22 }
  0x28   :  { %p540_p3 = scmp.lt.u32.totalorder %s536_s25, %s739_s3 }
  0x2a   :  { %p542_p4 = pnand %p540_p3, %p537_p2 }
  0x2c   :  { %545 = shalt.err (!%p542_p4)
}
  0x2d   :  { %s546_s7 = scalar_lea.vmem %s45_s22, 2048  ;;  %p551_p6 = scmp.lt.s32.totalorder %s45_s22, %s45_s22 }
  0x2e   :  { %p547_p5 = scmp.ne.s32.totalorder %s45_s22, %s546_s7  ;;  %p552_p7 = scmp.lt.s32.totalorder %s546_s7, %s546_s7 }
  0x30   :  { %p553_p8 = por %p552_p7, %p551_p6 }
  0x32   :  { %p554_p9 = pnand %p553_p8, %p547_p5 }
  0x34   :  { %557 = shalt.err (!%p554_p9)
}
  0x35   :  { %50 = dma.hbm_to_vmem [thread:$0]  %s739_s3, 2048, %s45_s22, [#allocation6], %s587_s28, %s587_s28, %s588_s29  }
  0x36   :  { %580 = dma.done.wait [#allocation3], 256  }
  0x37   :  { %581 = vsyncadd [#allocation3], 4294967040 }
  0x38   :  { %582 = dma.done.wait [#allocation6], 5120  }
  0x39   :  { %583 = vsyncadd [#allocation6], 4294962176  ;;  %v593_v0 = vmov 0.0|0.0   ;;  %v594_v1 = vmov 1966171168   ;;  %v116_v3 = vlaneseq  ;;  %v70_v4 = vld [vmem:[#allocation5] sm:$0xff] }
  0x3a   :  { %418 = vmatprep.subr.bf16.mxu0 %v593_v0  ;;  %454 = vmatprep.subr.bf16.mxu1 %v593_v0  ;;  %v114_v2 = vunpack.c.l.s4 %v594_v1  ;;  %v71_v5 = vld [vmem:[#allocation5 + $0x8] sm:$0xff]  ;;  %v72_v6 = vld [vmem:[#allocation5 + $0x10] sm:$0xff]  ;;  %v73_v8 = vld [vmem:[#allocation5 + $0x18] sm:$0xff]  ;;  %vm176_vm0 = vcmask 523264   ;;  %vm595_vm1 = vmmov 0  }
  0x3b   :  { %v419_v7 = vpack.c.bf16 %v71_v5, %v70_v4  ;;  %v422_v9 = vpack.c.bf16 %v73_v8, %v72_v6  ;;  %v117_v11 = vshrl.u32 %v116_v3, 7  ;;  %v74_v12 = vld [vmem:[#allocation5 + $0x20] sm:$0xff]  ;;  %v75_v13 = vld [vmem:[#allocation5 + $0x28] sm:$0xff]  ;;  %v76_v15 = vld [vmem:[#allocation5 + $0x30] sm:$0xff] }
  0x3c   :  { %v115_v10 = vunpack.c.0.s8 %v114_v2  ;;  %v425_v14 = vpack.c.bf16 %v75_v13, %v74_v12  ;;  %v77_v16 = vld [vmem:[#allocation5 + $0x38] sm:$0xff]  ;;  %v62_v18 = vld [vmem:[#allocation2] sm:$0x3]  ;;  %v63_v19 = vld [vmem:[#allocation2 + $0x2] sm:$0x3] }
  0x3d   :  { %420 = vmatpush1.bf16.msra.mxu0 %v419_v7  ;;  %v64_v20 = vld [vmem:[#allocation2 + $0x4] sm:$0x3]  ;;  %v65_v21 = vld [vmem:[#allocation2 + $0x6] sm:$0x3]  ;;  %v66_v22 = vld [vmem:[#allocation2 + $0x8] sm:$0x3]  ;;  %v109_v24 = vcombine.low %v62_v18, %v63_v19  ;;  %v428_v30 = vpack.c.bf16 %v77_v16, %v76_v15 }
  0x3e   :  { %421 = vmatprep.subr.bf16.mxu0 %v593_v0  ;;  %v675_v17 = vsub.s32 %v115_v10, %v117_v11  ;;  %v67_v23 = vld [vmem:[#allocation2 + $0xa] sm:$0x3]  ;;  %v68_v25 = vld [vmem:[#allocation2 + $0xc] sm:$0x3]  ;;  %v69_v26 = vld [vmem:[#allocation2 + $0xe] sm:$0x3]  ;;  %v110_v27 = vcombine.low %v64_v20, %v65_v21 }
  0x3f   :  { %v111_v28 = vcombine.low %v66_v22, %v67_v23  ;;  %v251_v29 = vld [vmem:[#allocation7] sm:$0xff]  ;;  %v112_v31 = vcombine.low %v68_v25, %v69_v26  ;;  %v252_v33 = vld [vmem:[#allocation7 + $0x8] sm:$0xff]  ;;  %v253_v34 = vld [vmem:[#allocation7 + $0x10] sm:$0xff] }
  0x40   :  { %v679_v32 = vrot.slane %v109_v24, %v675_v17  ;;  %v254_v35 = vld [vmem:[#allocation7 + $0x18] sm:$0xff]  ;;  %v78_v36 = vld [vmem:[#allocation5 + $0x40] sm:$0xff]  ;;  %v79_v37 = vld [vmem:[#allocation5 + $0x48] sm:$0xff]  ;;  %v683_v38 = vrot.slane %v110_v27, %v675_v17  ;;  %v455_v40 = vpack.c.bf16 %v252_v33, %v251_v29 }
  0x41   :  { %423 = vmatpush1.bf16.msra.mxu0 %v422_v9  ;;  %v686_v39 = vrot.slane %v111_v28, %v675_v17  ;;  %v689_v41 = vrot.slane %v112_v31, %v675_v17  ;;  %v458_v43 = vpack.c.bf16 %v254_v35, %v253_v34  ;;  %v431_v44 = vpack.c.bf16 %v79_v37, %v78_v36  ;;  %v255_v46 = vld [vmem:[#allocation7 + $0x20] sm:$0xff]  ;;  %v256_v47 = vld [vmem:[#allocation7 + $0x28] sm:$0xff]  ;;  %v80_v48 = vld [vmem:[#allocation5 + $0x50] sm:$0xff] }
  0x42   :  { %424 = vmatprep.subr.bf16.mxu0 %v593_v0  ;;  %v142_v42 = vcombine.high %v679_v32, %v683_v38  ;;  %456 = vmatpush3.bf16.msra.mxu1 %v455_v40  ;;  %v81_v49 = vld [vmem:[#allocation5 + $0x58] sm:$0xff]  ;;  %v461_v52 = vpack.c.bf16 %v256_v47, %v255_v46  ;;  %v257_v55 = vld [vmem:[#allocation7 + $0x30] sm:$0xff]  ;;  %v82_v57 = vld [vmem:[#allocation5 + $0x60] sm:$0xff]  ;;  %v141_v15 = vcombine.low %v679_v32, %v683_v38  ;;  %v596_v31 = vmov 0.0  }
  0x43   :  { %v144_v45 = vcombine.high %v686_v39, %v689_v41  ;;  %457 = vmatprep.subr.bf16.mxu1 %v593_v0  ;;  %v434_v53 = vpack.c.bf16 %v81_v49, %v80_v48  ;;  %v258_v56 = vld [vmem:[#allocation7 + $0x38] sm:$0xff]  ;;  %v83_v58 = vld [vmem:[#allocation5 + $0x68] sm:$0xff]  ;;  %v259_v61 = vld [vmem:[#allocation7 + $0x40] sm:$0xff]  ;;  %v143_v16 = vcombine.low %v686_v39, %v689_v41  ;;  %415 = vmatprep.mubr.msk.f32.mxu1 %vm595_vm1, %v596_v31 }
  0x44   :  { %v158_v50 = vrot.slane %v142_v42, %v675_v17  ;;  %v464_v59 = vpack.c.bf16 %v258_v56, %v257_v55  ;;  %v437_v60 = vpack.c.bf16 %v83_v58, %v82_v57  ;;  %v260_v62 = vld [vmem:[#allocation7 + $0x48] sm:$0xff]  ;;  %v84_v63 = vld [vmem:[#allocation5 + $0x70] sm:$0xff]  ;;  %v85_v1 = vld [vmem:[#allocation5 + $0x78] sm:$0xff]  ;;  %v151_v21 = vrot.slane %v141_v15, %v675_v17 }
  0x45   :  { %426 = vmatpush1.bf16.msra.mxu0 %v425_v14  ;;  %v172_v51 = vrot.slane %v144_v45, %v675_v17  ;;  %v467_v2 = vpack.c.bf16 %v260_v62, %v259_v61  ;;  %v440_v3 = vpack.c.bf16 %v85_v1, %v84_v63  ;;  %v261_v4 = vld [vmem:[#allocation7 + $0x50] sm:$0xff]  ;;  %v262_v5 = vld [vmem:[#allocation7 + $0x58] sm:$0xff]  ;;  %v86_v6 = vld [vmem:[#allocation5 + $0x80] sm:$0xff]  ;;  %v165_v22 = vrot.slane %v143_v16, %v675_v17 }
  0x46   :  { %427 = vmatprep.subr.bf16.mxu0 %v593_v0  ;;  %459 = vmatpush3.bf16.msra.mxu1 %v458_v43  ;;  %v87_v7 = vld [vmem:[#allocation5 + $0x88] sm:$0xff]  ;;  %v470_v8 = vpack.c.bf16 %v262_v5, %v261_v4  ;;  %v88_v10 = vld [vmem:[#allocation5 + $0x90] sm:$0xff]  ;;  %v89_v11 = vld [vmem:[#allocation5 + $0x98] sm:$0xff] }
  0x47   :  { %v174_v54 = vcombine.low %v158_v50, %v172_v51  ;;  %460 = vmatprep.subr.bf16.mxu1 %v593_v0  ;;  %v443_v9 = vpack.c.bf16 %v87_v7, %v86_v6  ;;  %v446_v12 = vpack.c.bf16 %v89_v11, %v88_v10  ;;  %v90_v13 = vld [vmem:[#allocation5 + $0xa0] sm:$0xff]  ;;  %v91_v14 = vld [vmem:[#allocation5 + $0xa8] sm:$0xff]  ;;  %v92_v19 = vld [vmem:[#allocation5 + $0xb0] sm:$0xff]  ;;  %v173_v24 = vcombine.low %v151_v21, %v165_v22 }
  0x48   :  { %v449_v18 = vpack.c.bf16 %v91_v14, %v90_v13  ;;  %v93_v20 = vld [vmem:[#allocation5 + $0xb8] sm:$0xff]  ;;  %v263_v25 = vld [vmem:[#allocation7 + $0x60] sm:$0xff]  ;;  %v264_v26 = vld [vmem:[#allocation7 + $0x68] sm:$0xff] }
  0x49   :  { %429 = vmatpush1.bf16.msra.mxu0 %v428_v30  ;;  %364 = vmatprep.mubr.msk.f32.mxu0 %vm176_vm0, %v174_v54  ;;  %v452_v23 = vpack.c.bf16 %v93_v20, %v92_v19  ;;  %v473_v27 = vpack.c.bf16 %v264_v26, %v263_v25  ;;  %v265_v28 = vld [vmem:[#allocation7 + $0x70] sm:$0xff]  ;;  %v266_v29 = vld [vmem:[#allocation7 + $0x78] sm:$0xff] }
  0x4a   :  { %430 = vmatprep.subr.bf16.mxu0 %v593_v0  ;;  %462 = vmatpush3.bf16.msra.mxu1 %v461_v52  ;;  %v476_v30 = vpack.c.bf16 %v266_v29, %v265_v28  ;;  %v363_v17 = vld [vmem:[%s738_s2] ss:$0 sm:$0xff] }
  0x4b   :  { %463 = vmatprep.subr.bf16.mxu1 %v593_v0 }
  0x4d   :  { %432 = vmatpush1.bf16.msra.mxu0 %v431_v44 }
  0x4e   :  { %433 = vmatprep.subr.bf16.mxu0 %v593_v0  ;;  %465 = vmatpush3.bf16.msra.mxu1 %v464_v59 }
  0x4f   :  { %466 = vmatprep.subr.bf16.mxu1 %v593_v0 }
  0x51   :  { %435 = vmatpush1.bf16.msra.mxu0 %v434_v53 }
  0x52   :  { %436 = vmatprep.subr.bf16.mxu0 %v593_v0  ;;  %468 = vmatpush3.bf16.msra.mxu1 %v467_v2 }
  0x53   :  { %469 = vmatprep.subr.bf16.mxu1 %v593_v0 }
  0x55   :  { %438 = vmatpush1.bf16.msra.mxu0 %v437_v60 }
  0x56   :  { %439 = vmatprep.subr.bf16.mxu0 %v593_v0  ;;  %471 = vmatpush3.bf16.msra.mxu1 %v470_v8 }
  0x57   :  { %472 = vmatprep.subr.bf16.mxu1 %v593_v0 }
  0x59   :  { %441 = vmatpush1.bf16.msra.mxu0 %v440_v3 }
  0x5a   :  { %442 = vmatprep.subr.bf16.mxu0 %v593_v0  ;;  %474 = vmatpush3.bf16.msra.mxu1 %v473_v27 }
  0x5b   :  { %475 = vmatprep.subr.bf16.mxu1 %v593_v0 }
  0x5d   :  { %444 = vmatpush1.bf16.msra.mxu0 %v443_v9 }
  0x5e   :  { %445 = vmatprep.subr.bf16.mxu0 %v593_v0  ;;  %477 = vmatpush3.bf16.msra.mxu1 %v476_v30 }
  0x61   :  { %447 = vmatpush1.bf16.msra.mxu0 %v446_v12 }
  0x62   :  { %448 = vmatprep.subr.bf16.mxu0 %v593_v0 }
  0x65   :  { %450 = vmatpush1.bf16.msra.mxu0 %v449_v18 }
  0x66   :  { %451 = vmatprep.subr.bf16.mxu0 %v593_v0  ;;  %v365_v0 = vld [vmem:[%s740_s4] ss:$0 sm:$0xff] }
  0x69   :  { %453 = vmatpush1.bf16.msra.mxu0 %v452_v23 }
  0x6c   :  { %244 = vmatmul.mubr.f32.vlgmr.msra.gmra.mrb[0].mxu0 %v173_v24 }
 0x13f   :  { %v245_v32 = vpop.f32.mrb[0].mxu0 }
 0x140   :  { %v246_v33 = vadd.f32 %v363_v17, %v245_v32  ;;  %v247_v34 = vpop.f32.mrb[1].mxu0 }
 0x142   :  { %v249_v35 = vmul.f32 %v246_v33, %v246_v33 }
 0x144   :  { %v250_v36 = vmul.f32 %v249_v35, %v246_v33 }
 0x146   :  { %416 = vmatmul.mubr.f32.vlgmr.msra.gmra.mrb[0].mxu1 %v250_v36 }
 0x219   :  { %v340_v37 = vpop.f32.mrb[0].mxu1 }
 0x21a   :  { %v341_v38 = vadd.f32 %v365_v0, %v340_v37  ;;  %v417_v39 = vpop.f32.mrb[1].mxu1 }
 0x21c   :  { %344 = vst [vmem:[#allocation8] sm:$0xff] %v341_v38 }
 0x21d   :  { %349 = vsyncadd [#allocation4], 112  ;;  %s597_s10 = smov [#allocation8]  }
 0x21e   :  { %s350_s11 = sshll.u32 %s597_s10, 4  ;;  %s351_s11 = int_to_ptr.vmem [resolvable:$true] %s350_s11 }
 0x21f   :  { %s558_s12 = scalar_lea.vmem %s351_s11, 16  ;;  %s562_s2 = scalar_lea.vmem %s351_s11, 128 }
 0x220   :  { %p559_p10 = scmp.ne.s32.totalorder %s351_s11, %s558_s12  ;;  %p563_p11 = scmp.lt.s32.totalorder %s351_s11, %s351_s11 }
 0x221   :  { %p564_p12 = scmp.lt.s32.totalorder %s562_s2, %s558_s12 }
 0x223   :  { %p565_p13 = por %p564_p12, %p563_p11 }
 0x225   :  { %p566_p0 = pnand %p565_p13, %p559_p10 }
 0x227   :  { %569 = shalt.err (!%p566_p0)
}
 0x228   :  { %s570_s4 = scalar_lea.hbm %s741_s5, 16 }
 0x229   :  { %p571_p1 = scmp.ne.s32.totalorder %s741_s5, %s570_s4  ;;  %p574_p2 = scmp.lt.u32.totalorder %s570_s4, %s741_s5 }
 0x22b   :  { %p576_p3 = pnand %p574_p2, %p571_p1 }
 0x22d   :  { %579 = shalt.err (!%p576_p3)
}
 0x22e   :  { %s598_s18 = smov 16   ;;  %s599_s19 = smov 1  }
 0x22f   :  { %356 = dma.vmem_to_hbm [thread:$0]  %s351_s11, 16, %s741_s5, [#allocation4], %s598_s18, %s598_s18, %s599_s19  }
 0x230   :  { %584 = dma.done.wait [#allocation4], 128  }
 0x231   :  { %585 = vsyncadd [#allocation4], 4294967168 }
 0x232   :  { %360 = vsyncpa [#allocation3], 1 }
 0x233   :  { %361 = vsyncpa [#allocation6], 1 }
 0x234   :  { %362 = vsyncpa [#allocation4], 1 }

</bundles_post_ra>
